<compile_context>
chip_gen: v5e
topology: v5e:2x2
jax: 0.10.0
libtpu: 0.0.40
codegen_flags: <defaults>
</compile_context>

<pallas_src>
import math

import jax
import jax.numpy as jnp
from jax.experimental import pallas as pl
from jax.experimental.pallas import tpu as pltpu


def _pe_add_kernel(x_ref, pe_ref, o_ref):
    # x_ref / o_ref: (bTile, tR, C) block; pe_ref: (1, tR, C), broadcast over batch.
    o_ref[...] = x_ref[...] + pe_ref[...]


def make_pe_table(d_model: int, max_len: int = 5000, dtype=jnp.float32) -> jnp.ndarray:
    """Deterministic sinusoidal table, identical to the PyTorch __init__.

    Built in float32 and cast ONCE here (init-time) to the model dtype so the
    per-call path has no cast pass.
    """
    assert d_model % 2 == 0, "PositionalEncoding requires an even d_model"
    position = jnp.arange(0, max_len, dtype=jnp.float32)[:, None]              # (max_len, 1)
    div_term = jnp.exp(
        jnp.arange(0, d_model, 2, dtype=jnp.float32) * -(math.log(10000.0) / d_model)
    )                                                                           # (d_model/2,)
    angles = position * div_term                                                # (max_len, d_model/2)
    pe = jnp.zeros((max_len, d_model), dtype=jnp.float32)
    pe = pe.at[:, 0::2].set(jnp.sin(angles))
    pe = pe.at[:, 1::2].set(jnp.cos(angles))
    return pe[None, :, :].astype(dtype)                                         # (1, max_len, d_model)


def _plan(B: int, T: int, D: int, itemsize: int, target_bytes: int):
    """Pick a lane-dense layout and tile sizes.

    Returns (R, C, tR, bTile, padD):
      * The (T, D) slab is viewed as (R, C) with C a multiple of 128 when a
        clean row-major flattening exists; otherwise padD > 0 and the feature
        dim is padded to C = next multiple of 128 (R = T).
      * tR is the row tile: either the full R (single block) or a multiple of
        the sublane packing factor sized for ~target_bytes per block, used with
        a pl.cdiv grid (ragged last block masked by Pallas).
      * bTile widens the x/out block over the batch axis when one row block is
        much smaller than target_bytes (bTile always divides B).
    """
    F = T * D
    pack = 8 * max(1, 4 // itemsize)          # sublane rows per packed 32-bit tile
    padD = 0
    if D % 128 == 0:
        C, R = D, T
    else:
        C = next((c for c in (512, 256, 128) if F % c == 0), 0)
        if C:
            R = F // C
        else:
            # No lane-dense flat view exists; pad features to 128 lanes so the
            # output stores stay unmasked (vst, not vst.msk).
            C = ((D + 127) // 128) * 128
            padD = C - D
            R = T

    rows_target = max(pack, (target_bytes // (C * itemsize)) // pack * pack)
    if rows_target >= R:
        tR = R                                 # single row block (legal: equals full dim)
        blk = max(1, R * C * itemsize)
        bTile = int(min(B, max(1, target_bytes // blk)))
        while B % bTile:                       # keep batch blocks full-sized
            bTile -= 1
    else:
        tR = rows_target                       # multiple of `pack` -> (8,128)-legal; cdiv grid
        bTile = 1
    return R, C, tR, bTile, padD


def positional_encoding_forward(x: jnp.ndarray, pe: jnp.ndarray, *,
                                dropout_p: float = 0.1, training: bool = False,
                                target_block_bytes: int = 2 << 20,
                                donate_x: bool = False) -> jnp.ndarray:
    """x: (B, T, D).  pe: (1, max_len, D), already in x.dtype.  Returns (B, T, D)."""
    if training and dropout_p > 0.0:
        # TODO(synk): fuse training-mode dropout into _pe_add_kernel (see header).
        raise NotImplementedError("training-mode dropout not implemented")

    B, T, D = x.shape
    assert T <= pe.shape[1], f"sequence length {T} exceeds max_len {pe.shape[1]}"
    pe_slice = pe[:, :T, :]
    if pe_slice.dtype != x.dtype:              # fallback; pre-cast the table at init
        pe_slice = pe_slice.astype(x.dtype)

    R, C, tR, bTile, padD = _plan(B, T, D, x.dtype.itemsize, target_block_bytes)

    if padD:
        x3 = jnp.pad(x, ((0, 0), (0, 0), (0, padD)))
        pe3 = jnp.pad(pe_slice, ((0, 0), (0, 0), (0, padD)))
    else:
        # Pure row-major reshapes; pe broadcasts only over B, so the flattened
        # (R, C) view is consistent for both operands.
        x3 = x.reshape(B, R, C)
        pe3 = pe_slice.reshape(1, R, C)

    nR = pl.cdiv(R, tR)
    nB = pl.cdiv(B, bTile)

    out = pl.pallas_call(
        _pe_add_kernel,
        out_shape=jax.ShapeDtypeStruct((B, R, C), x.dtype),
        grid_spec=pltpu.PrefetchScalarGridSpec(
            num_scalar_prefetch=0,
            grid=(nR, nB),                                         # batch fastest
            in_specs=[
                pl.BlockSpec((bTile, tR, C), lambda r, b: (b, r, 0)),   # x
                pl.BlockSpec((1, tR, C), lambda r, b: (0, r, 0)),       # pe (batch-independent)
            ],
            out_specs=pl.BlockSpec((bTile, tR, C), lambda r, b: (b, r, 0)),
        ),
        compiler_params=pltpu.CompilerParams(
            dimension_semantics=("parallel", "parallel")),
        input_output_aliases=({0: 0} if donate_x else {}),
    )(x3, pe3)

    if padD:
        return out[:, :, :D]
    return out.reshape(B, T, D)


if __name__ == "__main__":
    key = jax.random.PRNGKey(0)

    # (case_id, B, T, D, dtype, max_len, target_block_bytes)
    cases = [
        (0, 2, 8, 32, jnp.float32, 64, 2 << 20),     # main case: flat lane-dense view (C=256)
        (1, 3, 7, 24, jnp.float32, 32, 2 << 20),     # lane-padding path (D -> 128)
        (2, 2, 20, 128, jnp.float32, 64, 4096),      # multi-block rows + ragged last block
        (3, 2, 16, 64, jnp.bfloat16, 32, 2 << 20),   # bf16 sublane packing, batch-widened blocks
    ]

    for cid, B, T, D, dtype, max_len, tb in cases:
        k = jax.random.fold_in(key, cid)
        x = jax.random.normal(k, (B, T, D), dtype=jnp.float32).astype(dtype)
        pe = make_pe_table(D, max_len=max_len, dtype=dtype)

        out = positional_encoding_forward(x, pe, dropout_p=0.1, training=False,
                                          target_block_bytes=tb)
        out = jax.block_until_ready(out)

        # plain-JAX reference (same dtype semantics: pe pre-cast to x.dtype)
        ref = x + pe[:, :T, :]
        assert out.shape == (B, T, D), f"case {cid}: bad shape {out.shape}"
        if dtype == jnp.float32:
            atol, rtol = 1e-6, 0.0
        else:
            atol, rtol = 2e-2, 2e-2
        assert jnp.allclose(out.astype(jnp.float32), ref.astype(jnp.float32),
                            atol=atol, rtol=rtol), f"case {cid}: mismatch vs reference"

    print("KERNEL_OK")
</pallas_src>

<mosaic_0001>
module attributes {stable_mosaic.version = 11 : i64} {
  func.func @_pe_add_kernel(%arg0: i32, %arg1: i32, %arg2: memref<2x1x256xf32, #tpu.memory_space<vmem>>, %arg3: memref<1x1x256xf32, #tpu.memory_space<vmem>>, %arg4: memref<2x1x256xf32, #tpu.memory_space<vmem>>) attributes {dimension_semantics = [#tpu.dimension_semantics<parallel>, #tpu.dimension_semantics<parallel>], iteration_bounds = array<i64: 1, 1>, scalar_prefetch = 0 : i64, scratch_operands = 0 : i64, tpu.core_type = #tpu.core_type<tc>, window_params = [{transform_indices = @transform_0, window_bounds = array<i64: 2, 1, 256>}, {transform_indices = @transform_1, window_bounds = array<i64: 1, 1, 256>}, {transform_indices = @transform_2, window_bounds = array<i64: 2, 1, 256>}]} {
    %c0 = arith.constant 0 : index
    %c0_0 = arith.constant 0 : index
    %c0_1 = arith.constant 0 : index
    %0 = vector.load %arg2[%c0, %c0_0, %c0_1] : memref<2x1x256xf32, #tpu.memory_space<vmem>>, vector<2x1x256xf32>
    %c0_2 = arith.constant 0 : index
    %c0_3 = arith.constant 0 : index
    %c0_4 = arith.constant 0 : index
    %1 = vector.load %arg3[%c0_2, %c0_3, %c0_4] : memref<1x1x256xf32, #tpu.memory_space<vmem>>, vector<1x1x256xf32>
    %2 = vector.broadcast %1 : vector<1x1x256xf32> to vector<2x1x256xf32>
    %3 = arith.addf %0, %2 : vector<2x1x256xf32>
    %c0_5 = arith.constant 0 : index
    %c0_6 = arith.constant 0 : index
    %c0_7 = arith.constant 0 : index
    %4 = vector.load %arg4[%c0_5, %c0_6, %c0_7] : memref<2x1x256xf32, #tpu.memory_space<vmem>>, vector<2x1x256xf32>
    tpu.vector_store %arg4[%c0_5, %c0_6, %c0_7], %3 {strides = array<i32>} : memref<2x1x256xf32, #tpu.memory_space<vmem>>, vector<2x1x256xf32>,
    return
  }
  func.func @transform_0(%arg0: i32, %arg1: i32) -> (i32, i32, i32) {
    %c0_i32 = arith.constant 0 : i32
    %c0_i32_0 = arith.constant 0 : i32
    return %arg1, %arg0, %c0_i32 : i32, i32, i32
  }
  func.func @transform_1(%arg0: i32, %arg1: i32) -> (i32, i32, i32) {
    %c0_i32 = arith.constant 0 : i32
    %c0_i32_0 = arith.constant 0 : i32
    %c0_i32_1 = arith.constant 0 : i32
    return %c0_i32, %arg0, %c0_i32_0 : i32, i32, i32
  }
  func.func @transform_2(%arg0: i32, %arg1: i32) -> (i32, i32, i32) {
    %c0_i32 = arith.constant 0 : i32
    %c0_i32_0 = arith.constant 0 : i32
    return %arg1, %arg0, %c0_i32 : i32, i32, i32
  }
}

</mosaic_0001>

<bundles_post_ra>
// kernel: tpu_custom_call.1
= control target key start
LH: loop header
LB: loop body
LE: loop exit
PB: predicated region body
PF: predicated region fallthrough
CT: control target
= control target key end

     0   :  { %7 = vsyncpa [#allocation3], 0  ;;  %s185_s0 = inlined_call_operand.hbm [shape: f32[2,1,256], index: 0, kind: input, shape index: {}]   ;;  %s186_s1 = inlined_call_operand.hbm [shape: f32[1,1,256], index: 1, kind: input, shape index: {}]   ;;  %s187_s2 = inlined_call_operand.hbm [shape: f32[2,1,256], index: 2, kind: output, shape index: {}]  }
   0x1   :  { %8 = vsyncpa [#allocation6], 0 }
   0x2   :  { %9 = vsyncpa [#allocation4], 0  ;;  %s14_s11 = sshll.u32 %s185_s0, 4  ;;  %s156_s12 = smov [#allocation2]   ;;  %s15_s11 = int_to_ptr.hbm [resolvable:$true] %s14_s11 }
   0x3   :  { %s16_s13 = sshll.u32 %s156_s12, 4  ;;  %s28_s16 = sshll.u32 %s186_s1, 4  ;;  %s17_s13 = int_to_ptr.vmem [resolvable:$true] %s16_s13  ;;  %s29_s16 = int_to_ptr.hbm [resolvable:$true] %s28_s16 }
   0x4   :  { %s157_s17 = smov 32   ;;  %s158_s18 = smov 2  }
   0x5   :  { %22 = dma.hbm_to_vmem [thread:$0]  %s15_s11, 64, %s17_s13, [#allocation3], %s157_s17, %s157_s17, %s158_s18  }
   0x6   :  { %s159_s19 = smov [#allocation5]  }
   0x7   :  { %s30_s20 = sshll.u32 %s159_s19, 4  ;;  %s31_s20 = int_to_ptr.vmem [resolvable:$true] %s30_s20 }
   0x8   :  { %33 = dma.hbm_to_vmem [thread:$0]  %s29_s16, 32, %s31_s20, [#allocation6]  }
   0x9   :  { %150 = dma.done.wait [#allocation3], 64  }
   0xa   :  { %151 = vsyncadd [#allocation3], 4294967232 }
   0xb   :  { %152 = dma.done.wait [#allocation6], 32  }
   0xc   :  { %153 = vsyncadd [#allocation6], 4294967264  ;;  %v47_v0 = vlaneseq  ;;  %s160_s0 = smov [#allocation7]   ;;  %s59_s1 = sshll.u32 %s187_s2, 4  ;;  %v42_v1 = vld [vmem:[#allocation2] sm:$0x3]  ;;  %s60_s1 = int_to_ptr.hbm [resolvable:$true] %s59_s1 }
   0xd   :  { %s57_s21 = sshll.u32 %s160_s0, 4  ;;  %v44_v2 = vld [vmem:[#allocation5] sm:$0x3]  ;;  %v43_v3 = vld [vmem:[#allocation2 + $0x2] sm:$0x3]  ;;  %s58_s21 = int_to_ptr.vmem [resolvable:$true] %s57_s21 }
   0xe   :  { %vm49_vm0 = vcmp.lt.s32.totalorder %v47_v0, 256  ;;  %v45_v4 = vadd.f32 %v44_v2, %v42_v1  ;;  %v46_v5 = vadd.f32 %v44_v2, %v43_v3 }
  0x10   :  { %51 = vst.msk [vmem:[#allocation7] sm:$0x3] %vm49_vm0, %v45_v4 }
  0x11   :  { %52 = vst.msk [vmem:[#allocation7 + $0x2] sm:$0x3] %vm49_vm0, %v46_v5 }
  0x12   :  { %65 = dma.vmem_to_hbm [thread:$0]  %s58_s21, 64, %s60_s1, [#allocation4], %s157_s17, %s157_s17, %s158_s18  }
  0x13   :  { %154 = dma.done.wait [#allocation4], 64  }
  0x14   :  { %155 = vsyncadd [#allocation4], 4294967232 }
  0x15   :  { %70 = vsyncpa [#allocation3], 1 }
  0x16   :  { %71 = vsyncpa [#allocation6], 1 }
  0x17   :  { %72 = vsyncpa [#allocation4], 1 }

</bundles_post_ra>
